<compile_context>
chip_gen: v5e
topology: v5e:2x2
jax: 0.10.0
libtpu: 0.0.40
codegen_flags: <defaults>
</compile_context>

<pallas_src>
import jax
import jax.numpy as jnp
from jax import lax
from jax.experimental import pallas as pl
from jax.experimental.pallas import tpu as pltpu


def make_fcn_head_kernel(H, W, K, P):
    HW = H * W

    def kernel(x_ref, w1_ref, b1_ref, w2_ref, b2_ref, o_ref):
        x = x_ref[...]                       # (Cin, L) lane-dense slab, L = B*HW
        L = x.shape[1]

        # Within-image flat index / column (independent of which image a lane
        # belongs to). HW and W are powers of two at these shapes -> cheap &.
        idx = lax.broadcasted_iota(jnp.int32, (1, L), 1)
        li = (idx & (HW - 1)) if (HW & (HW - 1)) == 0 else (idx % HW)
        col = (li & (W - 1)) if (W & (W - 1)) == 0 else (li % W)

        # Hoisted edge predicates: one row mask per oi, one col mask per oj.
        row_mask, col_mask = {}, {}
        for o in range(-P, P + 1):
            if o < 0:
                row_mask[o] = li >= (-o) * W
                col_mask[o] = col >= -o
            elif o > 0:
                row_mask[o] = li < (H - o) * W
                col_mask[o] = col < (W - o)
            else:
                row_mask[o] = None
                col_mask[o] = None

        # Build the (K*K*Cin, L) tap stack: lane-axis roll + SAME-padding mask.
        # Unmasked lanes never read across an image boundary, so rolling the
        # full folded lane axis is safe.
        taps = []
        for di in range(K):
            for dj in range(K):
                oi, oj = di - P, dj - P
                s = oi * W + oj
                tap = x if s == 0 else pltpu.roll(x, shift=(-s) % L, axis=1)
                rm, cm = row_mask[oi], col_mask[oj]
                m = rm if cm is None else (cm if rm is None else rm & cm)
                if m is not None:
                    tap = jnp.where(m, tap, jnp.zeros_like(tap))
                taps.append(tap)
        stack = jnp.concatenate(taps, axis=0)            # (K*K*Cin, L)

        # ---- 3x3 conv (+ folded-BN bias) + ReLU: ONE stacked MXU matmul ----
        y = jnp.dot(w1_ref[...], stack, preferred_element_type=jnp.float32)
        y = jnp.maximum(y + b1_ref[...], 0.0)            # (Cmid, L), f32

        # TODO(synk): nn.Dropout(0.1) is a training-time stochastic op;
        # eval-mode (identity) semantics are implemented here.

        # ---- 1x1 conv (with bias) ----
        out = jnp.dot(w2_ref[...], y.astype(w2_ref.dtype),
                      preferred_element_type=jnp.float32)
        o_ref[...] = (out + b2_ref[...]).astype(o_ref.dtype)   # lane-dense store

    return kernel


def fcn_head_pallas(x_nchw, w1, bn_gamma, bn_beta, bn_mean, bn_var, w2, b2,
                    *, eps=1e-5, compute_dtype=jnp.float32, num_steps=None):
    """FCNHead forward (eval mode). x is NCHW; returns NCHW float32.

    compute_dtype=jnp.bfloat16 halves DMA/VMEM and uses the bf16 MXU path on
    v6e/v7x (f32 accumulation kept); the f32 default matches PyTorch numerics.
    """
    N, Cin, H, W = x_nchw.shape
    Cmid, _, K, _ = w1.shape
    Cout = w2.shape[0]
    P = K // 2
    HW = H * W

    # Fold BatchNorm (eval) into conv1 weights; bias added post-matmul.
    scale = bn_gamma / jnp.sqrt(bn_var + eps)            # (Cmid,)
    bias = bn_beta - bn_mean * scale                     # (Cmid,)
    w1_folded = w1 * scale[:, None, None, None]          # (Cmid, Cin, K, K)

    # Stacked contraction layout matching the in-kernel tap stack:
    # column index = (di*K + dj)*Cin + c.
    w1_stacked = jnp.transpose(w1_folded, (0, 2, 3, 1)).reshape(Cmid, K * K * Cin)
    w2_2d = w2.reshape(Cout, Cmid)
    b1_col = bias.reshape(Cmid, 1).astype(jnp.float32)
    b2_col = b2.reshape(Cout, 1).astype(jnp.float32)

    # Grid: keep >= 2 steps when N >= 2 (v7x has 2 TCs); pad batch if needed.
    if num_steps is None:
        num_steps = min(N, 2)
    B = (N + num_steps - 1) // num_steps
    Npad = num_steps * B
    x_pad = x_nchw
    if Npad != N:
        x_pad = jnp.concatenate(
            [x_nchw, jnp.zeros((Npad - N, Cin, H, W), x_nchw.dtype)], axis=0)

    # Fold batch into the lane axis: (Npad, Cin, HW) -> (Cin, Npad*HW).
    x_lane = jnp.transpose(x_pad.reshape(Npad, Cin, HW), (1, 0, 2)).reshape(
        Cin, Npad * HW).astype(compute_dtype)
    w1_stacked = w1_stacked.astype(compute_dtype)
    w2_2d = w2_2d.astype(compute_dtype)

    LANES = B * HW
    weight_args = (w1_stacked, b1_col, w2_2d, b2_col)

    def const_spec(a):  # grid-invariant operand: block 0 every step (no re-fetch)
        return pl.BlockSpec(a.shape, lambda i, nd=a.ndim: (0,) * nd)

    in_specs = [pl.BlockSpec((Cin, LANES), lambda i: (0, i))]
    in_specs += [const_spec(a) for a in weight_args]
    out_spec = pl.BlockSpec((Cout, LANES), lambda i: (0, i))

    kernel = make_fcn_head_kernel(H, W, K, P)
    out_lane = pl.pallas_call(
        kernel,
        out_shape=jax.ShapeDtypeStruct((Cout, Npad * HW), jnp.float32),
        grid_spec=pltpu.PrefetchScalarGridSpec(
            num_scalar_prefetch=0,
            grid=(num_steps,),
            in_specs=in_specs,
            out_specs=out_spec),
        compiler_params=pltpu.CompilerParams(
            dimension_semantics=("parallel",)),   # steps independent (v7x 2 TCs)
    )(x_lane, *weight_args)

    out = out_lane.reshape(Cout, Npad, HW).transpose(1, 0, 2)[:N]
    return out.reshape(N, Cout, H, W)


# ---------------- pure-JAX reference (eval-mode FCNHead) ----------------
def fcn_head_ref(x_nchw, w1, bn_gamma, bn_beta, bn_mean, bn_var, w2, b2,
                 eps=1e-5):
    hp = lax.Precision.HIGHEST
    K = w1.shape[2]
    P = K // 2
    y = lax.conv_general_dilated(
        x_nchw, w1, window_strides=(1, 1), padding=[(P, P), (P, P)],
        dimension_numbers=("NCHW", "OIHW", "NCHW"), precision=hp)
    scale = bn_gamma / jnp.sqrt(bn_var + eps)
    bias = bn_beta - bn_mean * scale
    y = y * scale[None, :, None, None] + bias[None, :, None, None]
    y = jnp.maximum(y, 0.0)
    # Dropout(0.1): identity in eval mode.
    out = lax.conv_general_dilated(
        y, w2, window_strides=(1, 1), padding=[(0, 0), (0, 0)],
        dimension_numbers=("NCHW", "OIHW", "NCHW"), precision=hp)
    return out + b2[None, :, None, None]


if __name__ == "__main__":
    # FCNHead(in_channels=16, channels=8): inter_channels = 16 // 4 = 4
    N, Cin, H, W = 2, 16, 16, 16
    Cout = 8
    Cmid = Cin // 4
    K = 3

    key = jax.random.PRNGKey(0)
    ks = jax.random.split(key, 8)
    w1 = 0.2 * jax.random.normal(ks[0], (Cmid, Cin, K, K), jnp.float32)
    bn_gamma = 1.0 + 0.1 * jax.random.normal(ks[1], (Cmid,), jnp.float32)
    bn_beta = 0.1 * jax.random.normal(ks[2], (Cmid,), jnp.float32)
    bn_mean = 0.1 * jax.random.normal(ks[3], (Cmid,), jnp.float32)
    bn_var = 0.5 + jnp.abs(jax.random.normal(ks[4], (Cmid,), jnp.float32))
    w2 = 0.2 * jax.random.normal(ks[5], (Cout, Cmid, 1, 1), jnp.float32)
    b2 = 0.1 * jax.random.normal(ks[6], (Cout,), jnp.float32)

    x_nchw = jax.random.normal(ks[7], (N, Cin, H, W), jnp.float32)

    out = jax.block_until_ready(
        fcn_head_pallas(x_nchw, w1, bn_gamma, bn_beta, bn_mean, bn_var, w2, b2))
    ref = jax.block_until_ready(
        fcn_head_ref(x_nchw, w1, bn_gamma, bn_beta, bn_mean, bn_var, w2, b2))

    err = float(jnp.max(jnp.abs(out - ref)))
    assert out.shape == (N, Cout, H, W)
    assert err < 1e-2, f"f32 max abs error {err}"

    # bf16 compute path (the v6e/v7x recommendation); looser tolerance by design.
    out_bf16 = jax.block_until_ready(
        fcn_head_pallas(x_nchw, w1, bn_gamma, bn_beta, bn_mean, bn_var, w2, b2,
                        compute_dtype=jnp.bfloat16))
    err_bf16 = float(jnp.max(jnp.abs(out_bf16 - ref)))
    assert err_bf16 < 1e-1, f"bf16 max abs error {err_bf16}"

    print("KERNEL_OK")
</pallas_src>

<mosaic_0001>
module attributes {stable_mosaic.version = 11 : i64} {
  func.func @kernel(%arg0: i32, %arg1: memref<16x256xf32, #tpu.memory_space<vmem>>, %arg2: memref<4x144xf32, #tpu.memory_space<vmem>>, %arg3: memref<4x1xf32, #tpu.memory_space<vmem>>, %arg4: memref<8x4xf32, #tpu.memory_space<vmem>>, %arg5: memref<8x1xf32, #tpu.memory_space<vmem>>, %arg6: memref<8x256xf32, #tpu.memory_space<vmem>>) attributes {dimension_semantics = [#tpu.dimension_semantics<parallel>], iteration_bounds = array<i64: 2>, scalar_prefetch = 0 : i64, scratch_operands = 0 : i64, tpu.core_type = #tpu.core_type<tc>, window_params = [{transform_indices = @transform_0, window_bounds = array<i64: 16, 256>}, {pipeline_mode = #tpu.pipeline_mode<synchronous>, transform_indices = @transform_1, window_bounds = array<i64: 4, 144>}, {pipeline_mode = #tpu.pipeline_mode<synchronous>, transform_indices = @transform_2, window_bounds = array<i64: 4, 1>}, {pipeline_mode = #tpu.pipeline_mode<synchronous>, transform_indices = @transform_3, window_bounds = array<i64: 8, 4>}, {pipeline_mode = #tpu.pipeline_mode<synchronous>, transform_indices = @transform_4, window_bounds = array<i64: 8, 1>}, {transform_indices = @transform_5, window_bounds = array<i64: 8, 256>}]} {
    %c0 = arith.constant 0 : index
    %c0_0 = arith.constant 0 : index
    %0 = vector.load %arg1[%c0, %c0_0] : memref<16x256xf32, #tpu.memory_space<vmem>>, vector<16x256xf32>
    %1 = tpu.iota {dimensions = array<i32: 1>} : vector<1x256xi32>
    %c255_i32 = arith.constant 255 : i32
    %2 = vector.broadcast %c255_i32 : i32 to vector<1x256xi32>
    %3 = arith.andi %1, %2 : vector<1x256xi32>
    %c15_i32 = arith.constant 15 : i32
    %4 = vector.broadcast %c15_i32 : i32 to vector<1x256xi32>
    %5 = arith.andi %3, %4 : vector<1x256xi32>
    %c16_i32 = arith.constant 16 : i32
    %6 = vector.broadcast %c16_i32 : i32 to vector<1x256xi32>
    %7 = arith.cmpi sge, %3, %6 : vector<1x256xi32>
    %c1_i32 = arith.constant 1 : i32
    %8 = vector.broadcast %c1_i32 : i32 to vector<1x256xi32>
    %9 = arith.cmpi sge, %5, %8 : vector<1x256xi32>
    %c240_i32 = arith.constant 240 : i32
    %10 = vector.broadcast %c240_i32 : i32 to vector<1x256xi32>
    %11 = arith.cmpi slt, %3, %10 : vector<1x256xi32>
    %c15_i32_1 = arith.constant 15 : i32
    %12 = vector.broadcast %c15_i32_1 : i32 to vector<1x256xi32>
    %13 = arith.cmpi slt, %5, %12 : vector<1x256xi32>
    %c17_i32 = arith.constant 17 : i32
    %14 = tpu.dynamic_rotate %0 by %c17_i32 dim 1 : vector<16x256xf32>, i32 -> vector<16x256xf32>
    %15 = arith.andi %7, %9 : vector<1x256xi1>
    %cst = arith.constant 0.000000e+00 : f32
    %16 = vector.broadcast %cst : f32 to vector<16x256xf32>
    %17 = vector.shape_cast %15 : vector<1x256xi1> to vector<1x256xi1>
    %18 = vector.broadcast %17 : vector<1x256xi1> to vector<16x256xi1>
    %19 = arith.select %18, %14, %16 : vector<16x256xi1>, vector<16x256xf32>
    %c16_i32_2 = arith.constant 16 : i32
    %20 = tpu.dynamic_rotate %0 by %c16_i32_2 dim 1 : vector<16x256xf32>, i32 -> vector<16x256xf32>
    %cst_3 = arith.constant 0.000000e+00 : f32
    %21 = vector.broadcast %cst_3 : f32 to vector<16x256xf32>
    %22 = vector.shape_cast %7 : vector<1x256xi1> to vector<1x256xi1>
    %23 = vector.broadcast %22 : vector<1x256xi1> to vector<16x256xi1>
    %24 = arith.select %23, %20, %21 : vector<16x256xi1>, vector<16x256xf32>
    %c15_i32_4 = arith.constant 15 : i32
    %25 = tpu.dynamic_rotate %0 by %c15_i32_4 dim 1 : vector<16x256xf32>, i32 -> vector<16x256xf32>
    %26 = arith.andi %7, %13 : vector<1x256xi1>
    %cst_5 = arith.constant 0.000000e+00 : f32
    %27 = vector.broadcast %cst_5 : f32 to vector<16x256xf32>
    %28 = vector.shape_cast %26 : vector<1x256xi1> to vector<1x256xi1>
    %29 = vector.broadcast %28 : vector<1x256xi1> to vector<16x256xi1>
    %30 = arith.select %29, %25, %27 : vector<16x256xi1>, vector<16x256xf32>
    %c1_i32_6 = arith.constant 1 : i32
    %31 = tpu.dynamic_rotate %0 by %c1_i32_6 dim 1 : vector<16x256xf32>, i32 -> vector<16x256xf32>
    %cst_7 = arith.constant 0.000000e+00 : f32
    %32 = vector.broadcast %cst_7 : f32 to vector<16x256xf32>
    %33 = vector.shape_cast %9 : vector<1x256xi1> to vector<1x256xi1>
    %34 = vector.broadcast %33 : vector<1x256xi1> to vector<16x256xi1>
    %35 = arith.select %34, %31, %32 : vector<16x256xi1>, vector<16x256xf32>
    %c255_i32_8 = arith.constant 255 : i32
    %36 = tpu.dynamic_rotate %0 by %c255_i32_8 dim 1 : vector<16x256xf32>, i32 -> vector<16x256xf32>
    %cst_9 = arith.constant 0.000000e+00 : f32
    %37 = vector.broadcast %cst_9 : f32 to vector<16x256xf32>
    %38 = vector.shape_cast %13 : vector<1x256xi1> to vector<1x256xi1>
    %39 = vector.broadcast %38 : vector<1x256xi1> to vector<16x256xi1>
    %40 = arith.select %39, %36, %37 : vector<16x256xi1>, vector<16x256xf32>
    %c241_i32 = arith.constant 241 : i32
    %41 = tpu.dynamic_rotate %0 by %c241_i32 dim 1 : vector<16x256xf32>, i32 -> vector<16x256xf32>
    %42 = arith.andi %11, %9 : vector<1x256xi1>
    %cst_10 = arith.constant 0.000000e+00 : f32
    %43 = vector.broadcast %cst_10 : f32 to vector<16x256xf32>
    %44 = vector.shape_cast %42 : vector<1x256xi1> to vector<1x256xi1>
    %45 = vector.broadcast %44 : vector<1x256xi1> to vector<16x256xi1>
    %46 = arith.select %45, %41, %43 : vector<16x256xi1>, vector<16x256xf32>
    %c240_i32_11 = arith.constant 240 : i32
    %47 = tpu.dynamic_rotate %0 by %c240_i32_11 dim 1 : vector<16x256xf32>, i32 -> vector<16x256xf32>
    %cst_12 = arith.constant 0.000000e+00 : f32
    %48 = vector.broadcast %cst_12 : f32 to vector<16x256xf32>
    %49 = vector.shape_cast %11 : vector<1x256xi1> to vector<1x256xi1>
    %50 = vector.broadcast %49 : vector<1x256xi1> to vector<16x256xi1>
    %51 = arith.select %50, %47, %48 : vector<16x256xi1>, vector<16x256xf32>
    %c239_i32 = arith.constant 239 : i32
    %52 = tpu.dynamic_rotate %0 by %c239_i32 dim 1 : vector<16x256xf32>, i32 -> vector<16x256xf32>
    %53 = arith.andi %11, %13 : vector<1x256xi1>
    %cst_13 = arith.constant 0.000000e+00 : f32
    %54 = vector.broadcast %cst_13 : f32 to vector<16x256xf32>
    %55 = vector.shape_cast %53 : vector<1x256xi1> to vector<1x256xi1>
    %56 = vector.broadcast %55 : vector<1x256xi1> to vector<16x256xi1>
    %57 = arith.select %56, %52, %54 : vector<16x256xi1>, vector<16x256xf32>
    %58 = tpu.concatenate %19, %24, %30, %35, %0, %40, %46, %51, %57 in 0 : vector<16x256xf32>, vector<16x256xf32>, vector<16x256xf32>, vector<16x256xf32>, vector<16x256xf32>, vector<16x256xf32>, vector<16x256xf32>, vector<16x256xf32>, vector<16x256xf32> -> vector<144x256xf32>
    %c0_14 = arith.constant 0 : index
    %c0_15 = arith.constant 0 : index
    %59 = vector.load %arg2[%c0_14, %c0_15] : memref<4x144xf32, #tpu.memory_space<vmem>>, vector<4x144xf32>
    %cst_16 = arith.constant dense<0.000000e+00> : vector<4x256xf32>
    %60 = tpu.matmul %59, %58, %cst_16 {dimension_numbers = #tpu.dot_dimension_numbers<[1], [0], [0], [1], [0, 0, 1, 1], [], []>} : vector<4x144xf32>, vector<144x256xf32>, vector<4x256xf32> -> vector<4x256xf32>
    %c0_17 = arith.constant 0 : index
    %c0_18 = arith.constant 0 : index
    %61 = vector.load %arg3[%c0_17, %c0_18] : memref<4x1xf32, #tpu.memory_space<vmem>>, vector<4x1xf32>
    %62 = vector.broadcast %61 : vector<4x1xf32> to vector<4x256xf32>
    %63 = arith.addf %60, %62 : vector<4x256xf32>
    %cst_19 = arith.constant 0.000000e+00 : f32
    %64 = vector.broadcast %cst_19 : f32 to vector<4x256xf32>
    %65 = arith.maximumf %63, %64 : vector<4x256xf32>
    %c0_20 = arith.constant 0 : index
    %c0_21 = arith.constant 0 : index
    %66 = vector.load %arg4[%c0_20, %c0_21] : memref<8x4xf32, #tpu.memory_space<vmem>>, vector<8x4xf32>
    %cst_22 = arith.constant dense<0.000000e+00> : vector<8x256xf32>
    %67 = tpu.matmul %66, %65, %cst_22 {dimension_numbers = #tpu.dot_dimension_numbers<[1], [0], [0], [1], [0, 0, 1, 1], [], []>} : vector<8x4xf32>, vector<4x256xf32>, vector<8x256xf32> -> vector<8x256xf32>
    %c0_23 = arith.constant 0 : index
    %c0_24 = arith.constant 0 : index
    %68 = vector.load %arg5[%c0_23, %c0_24] : memref<8x1xf32, #tpu.memory_space<vmem>>, vector<8x1xf32>
    %69 = vector.broadcast %68 : vector<8x1xf32> to vector<8x256xf32>
    %70 = arith.addf %67, %69 : vector<8x256xf32>
    %c0_25 = arith.constant 0 : index
    %c0_26 = arith.constant 0 : index
    %71 = vector.load %arg6[%c0_25, %c0_26] : memref<8x256xf32, #tpu.memory_space<vmem>>, vector<8x256xf32>
    tpu.vector_store %arg6[%c0_25, %c0_26], %70 {strides = array<i32>} : memref<8x256xf32, #tpu.memory_space<vmem>>, vector<8x256xf32>,
    return
  }
  func.func @transform_0(%arg0: i32) -> (i32, i32) {
    %c0_i32 = arith.constant 0 : i32
    %c0_i32_0 = arith.constant 0 : i32
    return %c0_i32, %arg0 : i32, i32
  }
  func.func @transform_1(%arg0: i32) -> (i32, i32) {
    %c0_i32 = arith.constant 0 : i32
    %c0_i32_0 = arith.constant 0 : i32
    %c0_i32_1 = arith.constant 0 : i32
    return %c0_i32, %c0_i32_0 : i32, i32
  }
  func.func @transform_2(%arg0: i32) -> (i32, i32) {
    %c0_i32 = arith.constant 0 : i32
    %c0_i32_0 = arith.constant 0 : i32
    %c0_i32_1 = arith.constant 0 : i32
    return %c0_i32, %c0_i32_0 : i32, i32
  }
  func.func @transform_3(%arg0: i32) -> (i32, i32) {
    %c0_i32 = arith.constant 0 : i32
    %c0_i32_0 = arith.constant 0 : i32
    %c0_i32_1 = arith.constant 0 : i32
    return %c0_i32, %c0_i32_0 : i32, i32
  }
  func.func @transform_4(%arg0: i32) -> (i32, i32) {
    %c0_i32 = arith.constant 0 : i32
    %c0_i32_0 = arith.constant 0 : i32
    %c0_i32_1 = arith.constant 0 : i32
    return %c0_i32, %c0_i32_0 : i32, i32
  }
  func.func @transform_5(%arg0: i32) -> (i32, i32) {
    %c0_i32 = arith.constant 0 : i32
    %c0_i32_0 = arith.constant 0 : i32
    return %c0_i32, %arg0 : i32, i32
  }
}

</mosaic_0001>

<bundles_post_ra>
// kernel: tpu_custom_call.1
= control target key start
LH: loop header
LB: loop body
LE: loop exit
PB: predicated region body
PF: predicated region fallthrough
CT: control target
= control target key end

     0   :  { %10 = vsyncpa [#allocation3], 0  ;;  %s1226_s0 = inlined_call_operand.hbm [shape: f32[16,512], index: 0, kind: input, shape index: {}]   ;;  %s1227_s1 = inlined_call_operand.vmem [shape: f32[4,144], index: 1, kind: input, shape index: {}]   ;;  %s1228_s2 = inlined_call_operand.vmem [shape: f32[4,1], index: 2, kind: input, shape index: {}]   ;;  %s1229_s3 = inlined_call_operand.vmem [shape: f32[8,4], index: 3, kind: input, shape index: {}]   ;;  %s1230_s4 = inlined_call_operand.vmem [shape: f32[8,1], index: 4, kind: input, shape index: {}]   ;;  %s1231_s5 = inlined_call_operand.hbm [shape: f32[8,512], index: 5, kind: output, shape index: {}]  }
   0x1   :  { %12 = vsyncpa [#allocation3 + $0x1], 0 }
   0x2   :  { %13 = vsyncpa [#allocation4], 0 }
   0x3   :  { %15 = vsyncpa [#allocation4 + $0x1], 0  ;;  %s936_s18 = smov 0   ;;  %s938_s19 = smov 0  }
   0x4   :  { %s940_s20 = smov 0   ;;  %s942_s21 = smov 0  }
   0x5 LB: > { %s957_s22 = sadd.s32 4294967295, %s892_s21   ;;  %s686_s23 = sadd.s32 4294967294, %s892_s21   ;;  %s892_s21 = sphi %s942_s21, %s1248_s21   ;;  %s888_s20 = sphi %s940_s20, %s1247_s20   ;;  %s884_s19 = sphi %s938_s19, %s1246_s19   ;;  %s880_s18 = sphi %s936_s18, %s1245_s18  }
   0x6   : > { %s961_s24 = sadd.s32 1, %s892_s21   ;;  %s28_s25 = sadd.s32 1, %s888_s20 }
   0x7   : > { %s25_s26 = ssub.s32 %s892_s21, %s961_s24  ;;  %p35_p0 = scmp.ne.s32.totalorder %s888_s20, %s884_s19 }
   0x8   : > { %p26_p1 = scmp.eq.s32.totalorder %s25_s26, 0  ;;  %p36_p2 = scmp.eq.s32.totalorder %s892_s21, 0 }
   0x9   : > { %p41_p3 = scmp.ne.s32.totalorder %s884_s19, %s880_s18  ;;  %p42_p4 = scmp.eq.s32.totalorder %s957_s22, 0 }
   0xa   : > { %s973_s27 = scalar_select %p26_p1, %s888_s20, %s28_s25  }
   0xb   : > { %p975_p5 = por %p36_p2, %p35_p0  ;;  %p979_p6 = por %p42_p4, %p41_p3 }
   0xc   : > { %p149_p7 = scmp.eq.s32.totalorder %s957_s22, 1  ;;  %p155_p8 = scmp.eq.s32.totalorder %s686_s23, 1 }
   0xd   : > { %p688_p9 = scmp.ge.s32.totalorder %s892_s21, 2  ;;  %p748_p10 = scmp.lt.s32.totalorder %s892_s21, 2 }
   0xe   : > { %p986_p11 = por %p149_p7, %p35_p0  ;;  %p990_p12 = por %p155_p8, %p41_p3 }
   0xf   : > { %s187_s7 = sand.u32 1, %s888_s20   ;;  %s734_s8 = sshll.u32 %s892_s21, 4 }
  0x10   : > { %s689_s9 = sshll.u32 %s187_s7, 5  ;;  %s196_s12 = scalar_lea.hbm %s1226_s0, %s734_s8 }
  0x11   : > { %s197_s13 = sshll.u32 %s196_s12, 4  ;;  %s191_s14 = scalar_lea.vmem [#allocation2], %s689_s9  ;;  %s198_s13 = int_to_ptr.hbm [resolvable:$true] %s197_s13 }
  0x12   : > { %s199_s15 = sshll.u32 %s191_s14, 4  ;;  %p1001_p13 = pnand %p748_p10, %p975_p5  ;;  %s200_s15 = int_to_ptr.vmem [resolvable:$true] %s199_s15 }
  0x13   : > { %p692_p0 = scmp.ge.s32.totalorder %s892_s21, 1  ;;  %s188_s17 = scalar_lea.sflag [#allocation3], %s187_s7 }
  0x14   : > { %s796_s23 = sshra.s32 %s198_s13, 4  ;;  %p800_p2 = pneg %p1001_p13  ;;  %s797_s23 = int_to_ptr.hbm [resolvable:$true] %s796_s23 }
  0x15   : > { %s798_s25 = scalar_lea.hbm %s797_s23, 32  ;;  %s803_s9 = scalar_lea.hbm %s1226_s0, 64 }
  0x16   : > { %p799_p1 = scmp.ne.s32.totalorder %s797_s23, %s798_s25  ;;  %p804_p5 = scmp.lt.s32.totalorder %s797_s23, %s1226_s0 }
  0x17   : > { %p805_p7 = scmp.lt.s32.totalorder %s803_s9, %s798_s25 }
  0x18   : > { %p801_p3 = pnand %p800_p2, %p799_p1 }
  0x19   : > { %p806_p8 = por %p805_p7, %p804_p5 }
  0x1a   : > { %p802_p4 = pneg %p801_p3 }
  0x1c   : > { %p807_p10 = pnand %p806_p8, %p802_p4 }
  0x1e   : > { %810 = shalt.err (!%p807_p10)
}
  0x1f   : > { %s894_s7 = smov 512   ;;  %s895_s11 = smov 256  }
  0x20   : > { %s896_s12 = smov 16   ;;  %p207_p1 = scmp.lt.s32.totalorder %s892_s21, 3 }
  0x21   : > { %743 = dma.hbm_to_vmem [thread:$0]  (!%p1001_p13), %s198_s13, 512, %s200_s15, %s188_s17, %s894_s7, %s895_s11, %s896_s12  }
  0x22   : > { %p208_p2 = pnand %p692_p0, %p207_p1 }
  0x23   : > { %s1020_s14 = sand.u32 (!%p208_p2), 1, %s884_s19  }
  0x24   : > { %211 = sbr.rel (%p208_p2) target bundleno = 514 (0x202), region = 40  ;;  %s693_s23 = sshll.u32 (!%p208_p2), %s1020_s14, 5 }
  0x25   : > { %s214_s25 = scalar_lea.sflag (!%p208_p2), [#allocation3], %s1020_s14  ;;  %s217_s26 = scalar_lea.vmem (!%p208_p2), [#allocation2], %s693_s23 }
  0x29   : > { %871 = dma.done.wait (%p979_p6), %s214_s25, 512  }
  0x2a   : > { %873 = vsyncadd (%p979_p6), %s214_s25, 4294966784  ;;  %v1028_v0 = vld [vmem:[%s217_s26 + $0x10] sm:$0xff]  ;;  %v1030_v1 = vld [vmem:[%s217_s26] sm:$0xff]  ;;  %s897_s13 = smov 112   ;;  %s898_s15 = smov 113   ;;  %v251_v5 = vlaneseq  ;;  %v905_v57 = vmov 0  }
  0x2b   : > { %400 = vrot.lane.b32.xlu0 %v1028_v0, %s897_s13  ;;  %398 = vrot.lane.b32.xlu1 %v1030_v1, %s897_s13  ;;  %v1035_v2 = vld [vmem:[%s217_s26 + $0x18] sm:$0xff]  ;;  %v1037_v3 = vld [vmem:[%s217_s26 + $0x8] sm:$0xff]  ;;  %s899_s29 = smov 127   ;;  %s900_s16 = smov 1  }
  0x2c   : > { %377 = vrot.lane.b32.xlu2 %v1028_v0, %s898_s15  ;;  %s901_s17 = smov 15   ;;  %s902_s8 = smov 16   ;;  %v1068_v7 = vand.u32 127, %v251_v5  ;;  %v442_v48 = vld [vmem:[%s1227_s1] sm:$0xff]  ;;  %795 = vset.pattern.permute.xlu0 %v905_v57 }
  0x2d   : > { %s903_s9 = smov 17   ;;  %s904_s28 = smov 111   ;;  %450 = vst [vmem:[#allocation1] ss:$2 sm:$0xff] %v442_v48  ;;  %v443_v56 = vld [vmem:[%s1228_s2] sm:$0xf]  ;;  %794 = vset.pattern.permute.xlu2 %v905_v57 }
  0x2e   : > { %v253_v8 = vadd.s32 128, %v1068_v7  ;;  %v254_v13 = vand.u32 255, %v1068_v7  ;;  %vm406_vm0 = vcmp.lt.s32.totalorder %v1068_v7, 112  ;;  %vm383_vm3 = vcmp.lt.s32.totalorder %v1068_v7, 113  ;;  %s600_s7 = scalar_lea.sflag [#allocation4], %s1020_s14  ;;  %s846_s25 = scalar_lea.hbm %s1231_s5, 32 }
  0x2f   : > { %vm362_vm6 = vcmp.lt.s32.totalorder %v1068_v7, 127  ;;  %vm341_vm9 = vcmp.lt.s32.totalorder %v1068_v7, 1  ;;  %vm318_vm11 = vcmp.lt.s32.totalorder %v1068_v7, 15  ;;  %vm297_vm13 = vcmp.lt.s32.totalorder %v1068_v7, 16 }
  0x30   : > { %v255_v12 = vand.u32 255, %v253_v8  ;;  %v1079_v16 = vand.u32 15, %v254_v13  ;;  %vm1116_vm10 = vcmp.ge.s32.totalorder %v254_v13, 16  ;;  %vm274_vm14 = vcmp.lt.s32.totalorder %v1068_v7, 17 }
  0x32   : > { %v1072_v14 = vand.u32 15, %v255_v12  ;;  %vm1075_vm1 = vcmp.lt.s32.totalorder %v255_v12, 240  ;;  %vm260_vm4 = vcmp.ge.s32.totalorder %v1079_v16, 1  ;;  %vm264_vm7 = vcmp.lt.s32.totalorder %v1079_v16, 15 }
  0x33   : > { %404 = vrot.lane.b32.xlu0 %v1035_v2, %s897_s13  ;;  %402 = vrot.lane.b32.xlu1 %v1037_v3, %s897_s13  ;;  %vm323_vm12 = vmand %vm1116_vm10, %vm264_vm7 }
  0x34   : > { %381 = vrot.lane.b32.xlu2 %v1035_v2, %s898_s15  ;;  %vm261_vm2 = vcmp.ge.s32.totalorder %v1072_v14, 1  ;;  %vm265_vm8 = vcmp.lt.s32.totalorder %v1072_v14, 15  ;;  %vm1149_vm15 = vmand %vm1116_vm10, %vm260_vm4  ;;  %v540_v14 = vld [vmem:[%s1230_s4] sm:$0xff] }
  0x35   : > { %vm389_vm5 = vmand %vm1075_vm1, %vm261_vm2 }
  0x3b   : > { %375 = vrot.lane.b32.xlu0 %v1030_v1, %s898_s15  ;;  %379 = vrot.lane.b32.xlu1 %v1037_v3, %s898_s15  ;;  %s694_s15 = sshll.u32 %s1020_s14, 4 }
  0x3c   : > { %356 = vrot.lane.b32.xlu2 %v1028_v0, %s899_s29 }
  0x43   : > { %360 = vrot.lane.b32.xlu0 %v1035_v2, %s899_s29  ;;  %354 = vrot.lane.b32.xlu1 %v1030_v1, %s899_s29 }
  0x44   : > { %358 = vrot.lane.b32.xlu2 %v1037_v3, %s899_s29  ;;  %s244_s29 = scalar_lea.vmem [#allocation5], %s694_s15 }
  0x4b   : > { %335 = vrot.lane.b32.xlu0 %v1028_v0, %s900_s16  ;;  %339 = vrot.lane.b32.xlu1 %v1035_v2, %s900_s16 }
  0x4c   : > { %333 = vrot.lane.b32.xlu2 %v1030_v1, %s900_s16 }
  0x53   : > { %337 = vrot.lane.b32.xlu0 %v1037_v3, %s900_s16  ;;  %312 = vrot.lane.b32.xlu1 %v1028_v0, %s901_s17  ;;  %s735_s16 = sshll.u32 %s957_s22, 4 }
  0x54   : > { %316 = vrot.lane.b32.xlu2 %v1035_v2, %s901_s17 }
  0x5b   : > { %310 = vrot.lane.b32.xlu0 %v1030_v1, %s901_s17  ;;  %314 = vrot.lane.b32.xlu1 %v1037_v3, %s901_s17 }
  0x5c   : > { %291 = vrot.lane.b32.xlu2 %v1028_v0, %s902_s8 }
  0x63   : > { %295 = vrot.lane.b32.xlu0 %v1035_v2, %s902_s8  ;;  %289 = vrot.lane.b32.xlu1 %v1030_v1, %s902_s8 }
  0x64   : > { %293 = vrot.lane.b32.xlu2 %v1037_v3, %s902_s8 }
  0x6b   : > { %268 = vrot.lane.b32.xlu0 %v1028_v0, %s903_s9  ;;  %272 = vrot.lane.b32.xlu1 %v1035_v2, %s903_s9 }
  0x6c   : > { %266 = vrot.lane.b32.xlu2 %v1030_v1, %s903_s9 }
  0x73   : > { %270 = vrot.lane.b32.xlu0 %v1037_v3, %s903_s9  ;;  %421 = vrot.lane.b32.xlu1 %v1028_v0, %s904_s28  ;;  %s611_s9 = scalar_lea.hbm %s1231_s5, %s735_s16 }
  0x74   : > { %425 = vrot.lane.b32.xlu2 %v1035_v2, %s904_s28  ;;  %s615_s10 = sshll.u32 %s611_s9, 4  ;;  %s616_s10 = int_to_ptr.hbm [resolvable:$true] %s615_s10 }
  0x75   : > { %s840_s11 = sshra.s32 %s616_s10, 4  ;;  %s841_s11 = int_to_ptr.hbm [resolvable:$true] %s840_s11 }
  0x76   : > { %s842_s12 = scalar_lea.hbm %s841_s11, 16  ;;  %p847_p3 = scmp.lt.s32.totalorder %s841_s11, %s1231_s5 }
  0x77   : > { %p843_p6 = scmp.ne.s32.totalorder %s841_s11, %s842_s12  ;;  %p848_p4 = scmp.lt.s32.totalorder %s846_s25, %s842_s12 }
  0x79   : > { %p844_p13 = pnand %p843_p6, %p986_p11  ;;  %p849_p5 = por %p848_p4, %p847_p3 }
  0x7b   : > { %419 = vrot.lane.b32.xlu0 %v1030_v1, %s904_s28  ;;  %423 = vrot.lane.b32.xlu1 %v1037_v3, %s904_s28  ;;  %s613_s28 = sshll.u32 %s244_s29, 4  ;;  %p845_p0 = pneg %p844_p13  ;;  %s614_s28 = int_to_ptr.vmem [resolvable:$true] %s613_s28 }
  0x7c   : > { %446 = vperm.xlu2 %794, %v443_v56  }
  0x7d   : > { %p850_p7 = pnand %p849_p5, %p845_p0 }
  0x83   : > { %543 = vperm.xlu0 %795, %v540_v14  }
  0x86   : > { %v378_v4 = vpop.permute.xlu2 %377 }
  0x8e   : > { %v382_v6 = vpop.permute.xlu2 %381 }
  0x8f   : > { %v385_v24 = vsel %vm383_vm3, %v378_v4, %v382_v6  ;;  %v387_v25 = vsel %vm383_vm3, %v382_v6, %v378_v4 }
  0x96   : > { %v357_v9 = vpop.permute.xlu2 %356 }
  0x9d   : > { %v401_v10 = vpop.permute.xlu0 %400  ;;  %v399_v11 = vpop.permute.xlu1 %398 }
  0x9e   : > { %v359_v21 = vpop.permute.xlu2 %358 }
  0xa5   : > { %v405_v17 = vpop.permute.xlu0 %404  ;;  %v403_v18 = vpop.permute.xlu1 %402 }
  0xa6   : > { %v408_v19 = vsel %vm406_vm0, %v401_v10, %v405_v17  ;;  %v410_v20 = vsel %vm406_vm0, %v405_v17, %v401_v10  ;;  %v407_v22 = vsel %vm406_vm0, %v399_v11, %v403_v18  ;;  %v409_v23 = vsel %vm406_vm0, %v403_v18, %v399_v11  ;;  %v334_v30 = vpop.permute.xlu2 %333  ;;  %v451_v18 = vld.sshfl [vmem:[#allocation1] sm:$0xff pattern:$0x75316420] }
  0xa7   : > { %457 = vmatpush.msra.mxu0 %v408_v19  ;;  %710 = vmatpush.msk.msra.mxu2 %vm1075_vm1, %v410_v20  ;;  %vm427_vm0 = vcmp.lt.s32.totalorder %v1068_v7, 111  ;;  %v452_v20 = vld.sshfl [vmem:[#allocation1 + $0x8] sm:$0xff pattern:$0x75316420] }
  0xa9   : > { %458 = vmatpush.msra.mxu0 %v407_v22  ;;  %711 = vmatpush.msk.msra.mxu2 %vm1075_vm1, %v409_v23 }
  0xab   : > { %695 = vmatpush.msk.msra.mxu0 %vm260_vm4, %v385_v24  ;;  %712 = vmatpush.msk.msra.mxu2 %vm389_vm5, %v387_v25 }
  0xad   : > { %v376_v26 = vpop.permute.xlu0 %375  ;;  %v380_v27 = vpop.permute.xlu1 %379 }
  0xae   : > { %v384_v28 = vsel %vm383_vm3, %v376_v26, %v380_v27  ;;  %v386_v29 = vsel %vm383_vm3, %v380_v27, %v376_v26  ;;  %v317_v37 = vpop.permute.xlu2 %316  ;;  %vm1162_vm3 = vmand %vm1075_vm1, %vm265_vm8  ;;  %vm454_vm1 = vcmask 130048  }
  0xaf   : > { %696 = vmatpush.msk.msra.mxu0 %vm260_vm4, %v384_v28  ;;  %713 = vmatpush.msk.msra.mxu2 %vm389_vm5, %v386_v29  ;;  %v539_v29 = vld [vmem:[%s1229_s3] sm:$0xff] }
  0xb5   : > { %v361_v31 = vpop.permute.xlu0 %360  ;;  %v355_v32 = vpop.permute.xlu1 %354 }
  0xb6   : > { %v364_v33 = vsel %vm362_vm6, %v357_v9, %v361_v31  ;;  %v366_v34 = vsel %vm362_vm6, %v361_v31, %v357_v9  ;;  %v363_v35 = vsel %vm362_vm6, %v355_v32, %v359_v21  ;;  %v365_v36 = vsel %vm362_vm6, %v359_v21, %v355_v32  ;;  %v292_v43 = vpop.permute.xlu2 %291 }
  0xb7   : > { %697 = vmatpush.msk.msra.mxu0 %vm264_vm7, %v364_v33  ;;  %714 = vmatpush.msk.msra.mxu2 %vm265_vm8, %v366_v34 }
  0xb9   : > { %698 = vmatpush.msk.msra.mxu0 %vm264_vm7, %v363_v35  ;;  %715 = vmatpush.msk.msra.mxu2 %vm265_vm8, %v365_v36 }
  0xbb   : > { %463 = vmatpush.msra.mxu0 %v1028_v0  ;;  %503 = vmatpush.msra.mxu2 %v1035_v2 }
  0xbd   : > { %v336_v38 = vpop.permute.xlu0 %335  ;;  %464 = vmatpush.msra.mxu0 %v1030_v1  ;;  %504 = vmatpush.msra.mxu2 %v1037_v3  ;;  %v340_v39 = vpop.permute.xlu1 %339 }
  0xbe   : > { %v345_v40 = vsel %vm341_vm9, %v340_v39, %v336_v38  ;;  %v343_v41 = vsel %vm341_vm9, %v336_v38, %v340_v39  ;;  %v294_v55 = vpop.permute.xlu2 %293 }
  0xbf   : > { %699 = vmatpush.msk.msra.mxu0 %vm260_vm4, %v345_v40  ;;  %716 = vmatpush.msk.msra.mxu2 %vm261_vm2, %v343_v41 }
  0xc5   : > { %v338_v44 = vpop.permute.xlu0 %337  ;;  %v313_v45 = vpop.permute.xlu1 %312 }
  0xc6   : > { %v344_v46 = vsel %vm341_vm9, %v338_v44, %v334_v30  ;;  %v342_v47 = vsel %vm341_vm9, %v334_v30, %v338_v44  ;;  %v322_v49 = vsel %vm318_vm11, %v317_v37, %v313_v45  ;;  %v320_v50 = vsel %vm318_vm11, %v313_v45, %v317_v37  ;;  %v267_v0 = vpop.permute.xlu2 %266 }
  0xc7   : > { %700 = vmatpush.msk.msra.mxu0 %vm260_vm4, %v344_v46  ;;  %717 = vmatpush.msk.msra.mxu2 %vm261_vm2, %v342_v47  ;;  %vm546_vm4 = vcmask 31744  }
  0xc9   : > { %701 = vmatpush.msk.msra.mxu0 %vm323_vm12, %v322_v49  ;;  %718 = vmatpush.msk.msra.mxu2 %vm265_vm8, %v320_v50 }
  0xcd   : > { %v311_v51 = vpop.permute.xlu0 %310  ;;  %v315_v52 = vpop.permute.xlu1 %314 }
  0xce   : > { %v321_v53 = vsel %vm318_vm11, %v315_v52, %v311_v51  ;;  %v319_v54 = vsel %vm318_vm11, %v311_v51, %v315_v52  ;;  %v426_v6 = vpop.permute.xlu2 %425 }
  0xcf   : > { %702 = vmatpush.msk.msra.mxu0 %vm323_vm12, %v321_v53  ;;  %719 = vmatpush.msk.msra.mxu2 %vm265_vm8, %v319_v54 }
  0xd5   : > { %v296_v58 = vpop.permute.xlu0 %295  ;;  %v290_v59 = vpop.permute.xlu1 %289 }
  0xd6   : > { %v301_v60 = vsel %vm297_vm13, %v296_v58, %v292_v43  ;;  %v299_v61 = vsel %vm297_vm13, %v292_v43, %v296_v58  ;;  %v300_v62 = vsel %vm297_vm13, %v294_v55, %v290_v59  ;;  %v298_v63 = vsel %vm297_vm13, %v290_v59, %v294_v55  ;;  %v447_v23 = vpop.permute.xlu2 %446 }
  0xd7   : > { %703 = vmatpush.msk.msra.mxu0 %vm1116_vm10, %v301_v60  ;;  %509 = vmatpush.msra.mxu2 %v299_v61 }
  0xd9   : > { %704 = vmatpush.msk.msra.mxu0 %vm1116_vm10, %v300_v62  ;;  %510 = vmatpush.msra.mxu2 %v298_v63 }
  0xdd   : > { %v269_v2 = vpop.permute.xlu0 %268  ;;  %v273_v3 = vpop.permute.xlu1 %272 }
  0xde   : > { %v278_v4 = vsel %vm274_vm14, %v273_v3, %v269_v2  ;;  %v276_v5 = vsel %vm274_vm14, %v269_v2, %v273_v3 }
  0xdf   : > { %705 = vmatpush.msk.msra.mxu0 %vm1149_vm15, %v278_v4  ;;  %720 = vmatpush.msk.msra.mxu2 %vm261_vm2, %v276_v5 }
  0xe5   : > { %v271_v8 = vpop.permute.xlu0 %270  ;;  %v422_v9 = vpop.permute.xlu1 %421 }
  0xe6   : > { %v277_v11 = vsel %vm274_vm14, %v271_v8, %v267_v0  ;;  %v429_v12 = vsel %vm427_vm0, %v422_v9, %v426_v6  ;;  %v275_v13 = vsel %vm274_vm14, %v267_v0, %v271_v8  ;;  %v431_v17 = vsel %vm427_vm0, %v426_v6, %v422_v9 }
  0xe7   : > { %706 = vmatpush.msk.msra.mxu0 %vm1149_vm15, %v277_v11  ;;  %707 = vmatpush.msk.msra.mxu1 %vm264_vm7, %v429_v12 }
  0xe8   : > { %721 = vmatpush.msk.msra.mxu2 %vm261_vm2, %v275_v13  ;;  %722 = vmatpush.msk.msra.mxu3 %vm1162_vm3, %v431_v17  ;;  %vm550_vm2 = vcmask 1043456  }
  0xe9   : > { %513 = vmatmul.f32.vlgmr.msra.gmra.mxu2 %v451_v18  ;;  %473 = vmatmul.f32.vlgmr.msra.gmra.mxu0 %v451_v18 }
  0xed   : > { %v420_v15 = vpop.permute.xlu0 %419  ;;  %v424_v19 = vpop.permute.xlu1 %423 }
  0xee   : > { %v428_v21 = vsel %vm427_vm0, %v420_v15, %v424_v19  ;;  %v430_v22 = vsel %vm427_vm0, %v424_v19, %v420_v15 }
  0xef   : > { %708 = vmatpush.msk.msra.mxu1 %vm264_vm7, %v428_v21  ;;  %723 = vmatpush.msk.msra.mxu3 %vm1162_vm3, %v430_v22 }
  0xf0   : > { %724 = vmatmul.msk.f32.vlgmr.msra.gmra.mxu3 %vm454_vm1, %v452_v20  ;;  %709 = vmatmul.msk.f32.vlgmr.msra.gmra.mxu1 %vm454_vm1, %v452_v20 }
  0xf5   : > { %v544_v33 = vpop.permute.xlu0 %543 }
 0x166   : > { %v474_v24 = vpop.f32.mrf.mxu0 }
 0x167   : > { %v475_v25 = vadd.f32 %v474_v24, %v447_v23 }
 0x16c   : > { %v514_v26 = vpop.f32.mrf.mxu2 }
 0x16d   : > { %v494_v7 = vpop.f32.mrf.mxu1  ;;  %v515_v16 = vadd.f32 %v514_v26, %v447_v23 }
 0x16e   : > { %v495_v27 = vadd.f32 %v494_v7, %v475_v25 }
 0x170   : > { %v537_v28 = vmax.f32 %v495_v27, 0.0 }
 0x172   : > { %725 = vmatpush.msk.msrb.mxu1 %vm550_vm2, %v537_v28 }
 0x173   : > { %v534_v30 = vpop.f32.mrf.mxu3  ;;  %726 = vmatmul.msk.f32.vlgmr.msrb.gmra.mxu1 %vm546_vm4, %v539_v29 }
 0x174   : > { %v535_v31 = vadd.f32 %v534_v30, %v515_v16 }
 0x176   : > { %v538_v32 = vmax.f32 %v535_v31, 0.0 }
 0x178   : > { %727 = vmatpush.msk.msrb.mxu3 %vm550_vm2, %v538_v32 }
 0x179   : > { %728 = vmatmul.msk.f32.vlgmr.msrb.gmra.mxu3 %vm546_vm4, %v539_v29 }
 0x1f0   : > { %v574_v34 = vpop.f32.mrf.mxu1 }
 0x1f1   : > { %v575_v35 = vadd.f32 %v574_v34, %v544_v33 }
 0x1f3   : > { %597 = vst [vmem:[%s244_s29] sm:$0xff] %v575_v35 }
 0x1fc   : > { %v594_v36 = vpop.f32.mrf.mxu3 }
 0x1fd   : > { %v595_v37 = vadd.f32 %v594_v36, %v544_v33 }
 0x1ff   : > { %598 = vst [vmem:[%s244_s29 + $0x8] sm:$0xff] %v595_v37 }
 0x200   : > { %853 = shalt.err (!%p850_p7)
}
 0x201   : > { %738 = dma.vmem_to_hbm [thread:$0]  (%p986_p11), %s614_s28, 256, %s616_s10, %s600_s7  }
 0x202 PF: > { %s627_s14 = sand.u32 1, %s880_s18   ;;  %p745_p8 = pnand %p688_p9, %p990_p12 }
 0x203   : > { %s628_s15 = scalar_lea.sflag [#allocation4], %s627_s14 }
 0x204   : > { %p746_p10 = pneg %p745_p8 }
 0x206   : > { %875 = dma.done.wait (%p746_p10), %s628_s15, 256  }
 0x207   : > { %877 = vsyncadd (%p746_p10), %s628_s15, 4294967040  ;;  %p18_p1 = scmp.ge.s32.totalorder %s961_s24, 4   ;;  %s1245_s18 = smov %s884_s19 }
 0x208   : > { %s1246_s19 = smov %s888_s20  ;;  %s1247_s20 = smov %s973_s27 }
 0x209   : > { %s1248_s21 = smov %s961_s24  ;;  %20 = sbr.rel (!%p18_p1) target bundleno = 5 (0x5), region = 85 }
 0x20e   :  { %634 = vsyncpa [#allocation3], 1 }
 0x20f   :  { %636 = vsyncpa [#allocation3 + $0x1], 1 }
 0x210   :  { %637 = vsyncpa [#allocation4], 1 }
 0x211   :  { %639 = vsyncpa [#allocation4 + $0x1], 1 }

</bundles_post_ra>
